<compile_context>
chip_gen: v7x
topology: tpu7x:2x2x1
jax: 0.10.0
libtpu: 0.0.40
codegen_flags: <defaults>
</compile_context>

<pallas_src>
import jax
import jax.numpy as jnp
from jax import lax
from jax.experimental import pallas as pl
from jax.experimental.pallas import tpu as pltpu

LANE = 128
NEG_INF = -1e30          # sentinel for non-edges (representable in bf16)
EDGE_MIN = -1e29         # threshold: base > EDGE_MIN  <=>  real edge


# ---------------------------------------------------------------------------
# Helpers
# ---------------------------------------------------------------------------
def _round_up(x, m):
    return ((x + m - 1) // m) * m


def _pad2(a, rows, cols):
    return jnp.pad(a, ((0, rows - a.shape[0]), (0, cols - a.shape[1])))


def _full_spec(shape):
    return pl.BlockSpec(shape, lambda i: (0,) * len(shape))


def _const_spec(shape, single_buffer):
    """Grid-constant VMEM block; optionally single-buffered (saves VMEM)."""
    idx = lambda i: (0,) * len(shape)
    if single_buffer:
        return pl.BlockSpec(shape, idx, pipeline_mode=pl.Buffered(1))
    return pl.BlockSpec(shape, idx)


def _vmem_caps():
    """(physical VMEM bytes, vmem_limit_bytes to request) for this generation."""
    try:
        cap = int(pltpu.get_tpu_info().vmem_capacity_bytes)
    except Exception:
        cap = 128 << 20
    limit = max(min(cap - (16 << 20), 100 << 20), 32 << 20)
    return cap, limit


def _choose_tiling(n, c_pad):
    """n_pad (multiple of 128) and destination-row tile size for attention."""
    n_pad = _round_up(max(n, 1), LANE)
    _, limit = _vmem_caps()
    h_bytes = n_pad * c_pad * 4                         # resident h (single buffer)
    # per tile-row bytes: bf16 base x2 buffers + ~3 f32 [T,N] temporaries
    # + f32 out tile x2 buffers
    per_row = n_pad * (2 * 2 + 3 * 4) + c_pad * 4 * 2
    avail = max(limit - h_bytes - (8 << 20), 2 << 20)
    t = int(avail // per_row)
    t = max(8, min(512, (t // 8) * 8))
    t = min(t, n_pad)
    while n_pad % t:
        t -= 8
    # prefer an even number of row tiles (v7x megacore balance)
    if (n_pad // t) % 2 == 1 and t >= 16 and (t // 2) % 8 == 0:
        t //= 2
    return n_pad, t


def _proj_tile(n_pad):
    for cand in (512, 384, 256, 128):
        if cand <= n_pad and n_pad % cand == 0:
            return cand
    return n_pad


# ---------------------------------------------------------------------------
# Pallas kernels
# ---------------------------------------------------------------------------
def _project_kernel(x_ref, w_ref, att_src_ref, h_ref, asrc_ref):
    # x: [T, F_pad], w: [F_pad, C_pad], att_src: [1, C_pad]
    h = jnp.dot(x_ref[...], w_ref[...], preferred_element_type=jnp.float32)      # [T, C]
    h_ref[...] = h
    # a_src tile as a lane-dense row vector [1, T]
    asrc_ref[...] = lax.dot_general(att_src_ref[...], h,
                                    (((1,), (1,)), ((), ())),
                                    preferred_element_type=jnp.float32)


def _gat_attn_kernel(coeff_ref, h_ref, asrc_ref, att_dst_ref, bias_ref,
                     base_ref, o_ref):
    # coeff: (1,1) SMEM scalar, h: [N_pad, C_pad] (resident), asrc: [1, N_pad],
    # att_dst/bias: [1, C_pad], base: [TILE_R, N_pad] bf16 (attr | sentinel),
    # out: [TILE_R, C_pad]
    tile_r = base_ref.shape[0]
    i = pl.program_id(0)
    row0 = pl.multiple_of(i * tile_r, 8)

    # Per-tile a_dst from the resident h (avoids a lane-width-1 HBM stream).
    h_dst = h_ref[pl.ds(row0, tile_r), :]                                         # [T, C]
    a_dst = jnp.sum(h_dst * att_dst_ref[...], axis=-1, keepdims=True)             # [T, 1]

    coeff = coeff_ref[0, 0]
    base = base_ref[...].astype(jnp.float32)                                      # [T, N]
    ealpha = jnp.where(base > EDGE_MIN, coeff * base, NEG_INF)

    e = a_dst + asrc_ref[...] + ealpha                                            # [T, N]
    e = jnp.maximum(e, 0.2 * e)                                                   # LeakyReLU(0.2)
    m = jnp.max(e, axis=-1, keepdims=True)
    p = jnp.exp(e - m)                                                            # non-edges -> 0
    inv = pl.reciprocal(jnp.sum(p, axis=-1, keepdims=True), approx=False)         # [T, 1]
    # TODO(synk): attention dropout (dropout_G) skipped -- inference mode.
    out = jnp.dot(p, h_ref[...], preferred_element_type=jnp.float32) * inv \
          + bias_ref[...]
    o_ref[...] = jnp.maximum(out, 0.0)                                            # ReLU


def _readout_kernel(x_ref, pool_ref, wlin_ref, blin_ref, o_ref):
    # x: [N_pad, C_pad], pool: [G, N_pad] (zero weight on padded nodes),
    # wlin: [C_pad, O], blin: [1, O]
    pooled = jnp.dot(pool_ref[...], x_ref[...], preferred_element_type=jnp.float32)
    # TODO(synk): FC dropout skipped -- inference mode (identity).
    y = jnp.dot(pooled, wlin_ref[...], preferred_element_type=jnp.float32) + blin_ref[...]
    o_ref[...] = 1.0 / (1.0 + jnp.exp(-y))                                        # sigmoid


# ---------------------------------------------------------------------------
# Pallas wrappers
# ---------------------------------------------------------------------------
def project(x_p, w_p, att_src_p, vmem_limit):
    n_pad, f_in_pad = x_p.shape
    c_pad = w_p.shape[1]
    tile_p = _proj_tile(n_pad)
    grid_p = n_pad // tile_p

    def build(single_buffer):
        return pl.pallas_call(
            _project_kernel,
            out_shape=(jax.ShapeDtypeStruct((n_pad, c_pad), jnp.float32),
                       jax.ShapeDtypeStruct((1, n_pad), jnp.float32)),
            grid=(grid_p,),
            in_specs=[
                pl.BlockSpec((tile_p, f_in_pad), lambda i: (i, 0)),      # x tile
                _const_spec((f_in_pad, c_pad), single_buffer),           # W
                _const_spec((1, c_pad), single_buffer),                  # att_src
            ],
            out_specs=(pl.BlockSpec((tile_p, c_pad), lambda i: (i, 0)),  # h tile
                       pl.BlockSpec((1, tile_p), lambda i: (0, i))),     # a_src tile
            compiler_params=pltpu.CompilerParams(
                dimension_semantics=("parallel",),
                vmem_limit_bytes=vmem_limit),
        )(x_p, w_p, att_src_p)

    try:
        return build(True)
    except Exception:
        return build(False)


def gat_attention(h, a_src, att_dst, bias, base_bf16, coeff, tile_r, vmem_limit):
    n_pad, c_pad = h.shape
    grid_r = n_pad // tile_r

    def build(single_buffer):
        return pl.pallas_call(
            _gat_attn_kernel,
            out_shape=jax.ShapeDtypeStruct((n_pad, c_pad), jnp.float32),
            grid=(grid_r,),
            in_specs=[
                pl.BlockSpec(memory_space=pltpu.MemorySpace.SMEM),       # coeff (1,1)
                _const_spec((n_pad, c_pad), single_buffer),              # h (resident)
                _const_spec((1, n_pad), single_buffer),                  # a_src row
                _const_spec((1, c_pad), single_buffer),                  # att_dst
                _const_spec((1, c_pad), single_buffer),                  # bias
                pl.BlockSpec((tile_r, n_pad), lambda i: (i, 0)),         # bf16 base tile
            ],
            out_specs=pl.BlockSpec((tile_r, c_pad), lambda i: (i, 0)),
            compiler_params=pltpu.CompilerParams(
                dimension_semantics=("parallel",),
                vmem_limit_bytes=vmem_limit),
        )(coeff, h, a_src, att_dst, bias, base_bf16)

    try:
        return build(True)
    except Exception:
        return build(False)


def readout(x_p, pool_p, w_lin_p, b_lin):
    g = pool_p.shape[0]
    o = w_lin_p.shape[1]
    return pl.pallas_call(
        _readout_kernel,
        out_shape=jax.ShapeDtypeStruct((g, o), jnp.float32),
        grid=(1,),
        in_specs=[_full_spec(x_p.shape), _full_spec(pool_p.shape),
                  _full_spec(w_lin_p.shape), _full_spec(b_lin.shape)],
        out_specs=_full_spec((g, o)),
    )(x_p, pool_p, w_lin_p, b_lin)


# ---------------------------------------------------------------------------
# Plain-JAX glue: edge list -> dense layer-independent base (built ONCE)
# ---------------------------------------------------------------------------
def _self_loop_edges(src, dst, edge_attr, n):
    """Add PyG-style self loops with fill_value='mean' (mean of incoming attrs)."""
    e_cnt = src.shape[0]
    seg_sum = jax.ops.segment_sum(edge_attr, dst, num_segments=n)                 # [N, 1]
    counts = jax.ops.segment_sum(jnp.ones((e_cnt, 1), jnp.float32), dst, num_segments=n)
    loop_attr = seg_sum / jnp.maximum(counts, 1.0)                                # [N, 1]
    loop_idx = jnp.arange(n, dtype=src.dtype)
    s_full = jnp.concatenate([src, loop_idx])
    d_full = jnp.concatenate([dst, loop_idx])
    attr_full = jnp.concatenate([edge_attr, loop_attr], axis=0)                   # [E+N, 1]
    return s_full, d_full, attr_full


def build_dense_base(src, dst, edge_attr, n, n_pad):
    """[N_pad, N_pad] bf16: edge -> raw attr, non-edge/padding -> NEG_INF sentinel."""
    s, d, attr = _self_loop_edges(src, dst, edge_attr, n)
    base = jnp.full((n_pad, n_pad), NEG_INF, jnp.float32).at[d, s].set(attr[:, 0])
    return base.astype(jnp.bfloat16)


# ---------------------------------------------------------------------------
# Parameters (deterministic synthetic init) and forward pass
# ---------------------------------------------------------------------------
def init_gat_layer_params(key, f_in, c):
    ks = jax.random.split(key, 6)
    s = 0.2
    return dict(
        w=jax.random.normal(ks[0], (f_in, c), jnp.float32) * s,
        att_src=jax.random.normal(ks[1], (1, c), jnp.float32) * s,
        att_dst=jax.random.normal(ks[2], (1, c), jnp.float32) * s,
        att_edge=jax.random.normal(ks[3], (1, c), jnp.float32) * s,
        w_edge=jax.random.normal(ks[4], (1, c), jnp.float32) * s,
        bias=jax.random.normal(ks[5], (1, c), jnp.float32) * s,
    )


def init_params(key, in_channels, hidden_channels, out_channels):
    layers = []
    f_in = in_channels
    for c in hidden_channels:
        key, sub = jax.random.split(key)
        layers.append(init_gat_layer_params(sub, f_in, c))
        f_in = c
    key, k1, k2 = jax.random.split(key, 3)
    return dict(
        layers=layers,
        w_lin=jax.random.normal(k1, (hidden_channels[-1], out_channels), jnp.float32) * 0.2,
        b_lin=jax.random.normal(k2, (1, out_channels), jnp.float32) * 0.2,
    )


def gat_forward(x, src, dst, edge_attr, pool, params, tile_r=None):
    n = x.shape[0]
    c_pad_max = max(_round_up(l["w"].shape[1], LANE) for l in params["layers"])
    if tile_r is None:
        n_pad, tile_r = _choose_tiling(n, c_pad_max)
    else:
        n_pad = _round_up(max(n, 1), LANE)
        tile_r = max(8, _round_up(tile_r, 8))
        tile_r = min(tile_r, n_pad)
        while n_pad % tile_r:
            tile_r -= 8
    _, vmem_limit = _vmem_caps()

    # Layer-independent N^2 base, built once, stored in bf16.
    base = build_dense_base(src, dst, edge_attr, n, n_pad)

    # Pad node features to 128 lanes (zero cols) and n_pad rows (zero rows).
    x_p = _pad2(x, n_pad, _round_up(x.shape[1], LANE))

    for layer in params["layers"]:
        c = layer["w"].shape[1]
        c_pad = _round_up(c, LANE)
        f_in_pad = x_p.shape[1]

        w_p = _pad2(layer["w"], f_in_pad, c_pad)
        att_src_p = _pad2(layer["att_src"], 1, c_pad)
        att_dst_p = _pad2(layer["att_dst"], 1, c_pad)
        bias_p = _pad2(layer["bias"], 1, c_pad)
        # edge_dim=1, heads=1  =>  alpha_edge = attr * (w_edge . att_edge)
        coeff = jnp.sum(layer["w_edge"] * layer["att_edge"]).reshape(1, 1).astype(jnp.float32)

        h, a_src = project(x_p, w_p, att_src_p, vmem_limit)
        x_p = gat_attention(h, a_src, att_dst_p, bias_p, base, coeff,
                            tile_r, vmem_limit)

    g = pool.shape[0]
    pool_p = _pad2(pool, g, n_pad)                    # padded node cols -> weight 0
    w_lin_p = _pad2(params["w_lin"], x_p.shape[1], params["w_lin"].shape[1])
    return readout(x_p, pool_p, w_lin_p, params["b_lin"])


# ---------------------------------------------------------------------------
# Pure-JAX reference (original unpadded dense formulation, full f32).
# ---------------------------------------------------------------------------
def gat_forward_ref(x, src, dst, edge_attr, pool, params):
    n = x.shape[0]
    for layer in params["layers"]:
        s, d, attr = _self_loop_edges(src, dst, edge_attr, n)
        a = jnp.sum((attr @ layer["w_edge"]) * layer["att_edge"], axis=-1)        # [E+N]
        adj = jnp.zeros((n, n), jnp.float32).at[d, s].set(1.0)
        ealpha = jnp.zeros((n, n), jnp.float32).at[d, s].set(a)
        h = x @ layer["w"]
        a_src = (h * layer["att_src"]).sum(-1)
        a_dst = (h * layer["att_dst"]).sum(-1)
        e = a_dst[:, None] + a_src[None, :] + ealpha
        e = jnp.where(e > 0, e, 0.2 * e)
        e = jnp.where(adj > 0, e, NEG_INF)
        p = jnp.exp(e - e.max(-1, keepdims=True)) * adj
        attn = p / p.sum(-1, keepdims=True)
        x = jnp.maximum(attn @ h + layer["bias"], 0.0)
    y = pool @ x
    y = y @ params["w_lin"] + params["b_lin"]
    return 1.0 / (1.0 + jnp.exp(-y))


# ---------------------------------------------------------------------------
if __name__ == "__main__":
    key = jax.random.PRNGKey(0)

    # Small synthetic graph batch: 2 graphs x 8 nodes, ring edges (both dirs).
    num_graphs = 2
    nodes_per_graph = 8
    N = num_graphs * nodes_per_graph
    in_channels = 8
    hidden_channels = [16, 16]
    out_channels = 2

    src_l, dst_l = [], []
    for g in range(num_graphs):
        base_i = g * nodes_per_graph
        for i in range(nodes_per_graph):
            j = (i + 1) % nodes_per_graph
            src_l += [base_i + i, base_i + j]
            dst_l += [base_i + j, base_i + i]
    src = jnp.array(src_l, dtype=jnp.int32)
    dst = jnp.array(dst_l, dtype=jnp.int32)
    E = src.shape[0]

    k_x, k_e, k_p = jax.random.split(key, 3)
    x = jax.random.normal(k_x, (N, in_channels), jnp.float32)
    edge_attr = jax.random.uniform(k_e, (E, 1), jnp.float32)

    batch = jnp.repeat(jnp.arange(num_graphs), nodes_per_graph)                   # [N]
    # global_mean_pool as a matmul: pool[g, n] = 1/|V_g| if batch[n] == g else 0
    onehot = (batch[None, :] == jnp.arange(num_graphs)[:, None]).astype(jnp.float32)
    pool = onehot / jnp.maximum(onehot.sum(axis=1, keepdims=True), 1.0)           # [G, N]

    params = init_params(k_p, in_channels, hidden_channels, out_channels)

    # Auto tiling: n_pad=128, tile_r=64 -> 2 pipelined destination-row tiles.
    out = gat_forward(x, src, dst, edge_attr, pool, params)
    out = jax.block_until_ready(out)

    ref = gat_forward_ref(x, src, dst, edge_attr, pool, params)
    assert out.shape == (num_graphs, out_channels)
    # bf16 storage of the edge-attr base introduces <=~0.4% relative rounding
    # on the attention logits; tolerance loosened accordingly.
    assert jnp.allclose(out, ref, atol=5e-3, rtol=5e-3), (out, ref)

    print("KERNEL_OK")
</pallas_src>

<mosaic_0001>
module attributes {stable_mosaic.version = 11 : i64} {
  func.func @_project_kernel(%arg0: i32, %arg1: memref<128x128xf32, #tpu.memory_space<vmem>>, %arg2: memref<128x128xf32, #tpu.memory_space<vmem>>, %arg3: memref<1x128xf32, #tpu.memory_space<vmem>>, %arg4: memref<128x128xf32, #tpu.memory_space<vmem>>, %arg5: memref<1x128xf32, #tpu.memory_space<vmem>>) attributes {dimension_semantics = [#tpu.dimension_semantics<parallel>], iteration_bounds = array<i64: 1>, scalar_prefetch = 0 : i64, scratch_operands = 0 : i64, tpu.core_type = #tpu.core_type<tc>, window_params = [{transform_indices = @transform_0, window_bounds = array<i64: 128, 128>}, {pipeline_mode = #tpu.pipeline_mode<synchronous>, transform_indices = @transform_1, window_bounds = array<i64: 128, 128>}, {pipeline_mode = #tpu.pipeline_mode<synchronous>, transform_indices = @transform_2, window_bounds = array<i64: 1, 128>}, {transform_indices = @transform_3, window_bounds = array<i64: 128, 128>}, {transform_indices = @transform_4, window_bounds = array<i64: 1, 128>}]} {
    %c0 = arith.constant 0 : index
    %c0_0 = arith.constant 0 : index
    %0 = vector.load %arg1[%c0, %c0_0] : memref<128x128xf32, #tpu.memory_space<vmem>>, vector<128x128xf32>
    %c0_1 = arith.constant 0 : index
    %c0_2 = arith.constant 0 : index
    %1 = vector.load %arg2[%c0_1, %c0_2] : memref<128x128xf32, #tpu.memory_space<vmem>>, vector<128x128xf32>
    %cst = arith.constant dense<0.000000e+00> : vector<128x128xf32>
    %2 = tpu.matmul %0, %1, %cst {dimension_numbers = #tpu.dot_dimension_numbers<[1], [0], [0], [1], [0, 0, 1, 1], [], []>} : vector<128x128xf32>, vector<128x128xf32>, vector<128x128xf32> -> vector<128x128xf32>
    %c0_3 = arith.constant 0 : index
    %c0_4 = arith.constant 0 : index
    %3 = vector.load %arg4[%c0_3, %c0_4] : memref<128x128xf32, #tpu.memory_space<vmem>>, vector<128x128xf32>
    tpu.vector_store %arg4[%c0_3, %c0_4], %2 {strides = array<i32>} : memref<128x128xf32, #tpu.memory_space<vmem>>, vector<128x128xf32>,
    %c0_5 = arith.constant 0 : index
    %c0_6 = arith.constant 0 : index
    %4 = vector.load %arg3[%c0_5, %c0_6] : memref<1x128xf32, #tpu.memory_space<vmem>>, vector<1x128xf32>
    %cst_7 = arith.constant dense<0.000000e+00> : vector<1x128xf32>
    %5 = tpu.matmul %4, %2, %cst_7 {dimension_numbers = #tpu.dot_dimension_numbers<[1], [1], [0], [0], [0, 0, 1, 0], [], []>} : vector<1x128xf32>, vector<128x128xf32>, vector<1x128xf32> -> vector<1x128xf32>
    %c0_8 = arith.constant 0 : index
    %c0_9 = arith.constant 0 : index
    %6 = vector.load %arg5[%c0_8, %c0_9] : memref<1x128xf32, #tpu.memory_space<vmem>>, vector<1x128xf32>
    tpu.vector_store %arg5[%c0_8, %c0_9], %5 {strides = array<i32>} : memref<1x128xf32, #tpu.memory_space<vmem>>, vector<1x128xf32>,
    return
  }
  func.func @transform_0(%arg0: i32) -> (i32, i32) {
    %c0_i32 = arith.constant 0 : i32
    %c0_i32_0 = arith.constant 0 : i32
    return %arg0, %c0_i32 : i32, i32
  }
  func.func @transform_1(%arg0: i32) -> (i32, i32) {
    %c0_i32 = arith.constant 0 : i32
    %c0_i32_0 = arith.constant 0 : i32
    %c0_i32_1 = arith.constant 0 : i32
    return %c0_i32, %c0_i32_0 : i32, i32
  }
  func.func @transform_2(%arg0: i32) -> (i32, i32) {
    %c0_i32 = arith.constant 0 : i32
    %c0_i32_0 = arith.constant 0 : i32
    %c0_i32_1 = arith.constant 0 : i32
    return %c0_i32, %c0_i32_0 : i32, i32
  }
  func.func @transform_3(%arg0: i32) -> (i32, i32) {
    %c0_i32 = arith.constant 0 : i32
    %c0_i32_0 = arith.constant 0 : i32
    return %arg0, %c0_i32 : i32, i32
  }
  func.func @transform_4(%arg0: i32) -> (i32, i32) {
    %c0_i32 = arith.constant 0 : i32
    %c0_i32_0 = arith.constant 0 : i32
    return %c0_i32, %arg0 : i32, i32
  }
}

module attributes {stable_mosaic.version = 11 : i64} {
  func.func @_project_kernel(%arg0: i32, %arg1: memref<128x128xf32, #tpu.memory_space<vmem>>, %arg2: memref<128x128xf32, #tpu.memory_space<vmem>>, %arg3: memref<1x128xf32, #tpu.memory_space<vmem>>, %arg4: memref<128x128xf32, #tpu.memory_space<vmem>>, %arg5: memref<1x128xf32, #tpu.memory_space<vmem>>) attributes {dimension_semantics = [#tpu.dimension_semantics<parallel>], iteration_bounds = array<i64: 1>, scalar_prefetch = 0 : i64, scratch_operands = 0 : i64, tpu.core_type = #tpu.core_type<tc>, window_params = [{transform_indices = @transform_0, window_bounds = array<i64: 128, 128>}, {pipeline_mode = #tpu.pipeline_mode<synchronous>, transform_indices = @transform_1, window_bounds = array<i64: 128, 128>}, {pipeline_mode = #tpu.pipeline_mode<synchronous>, transform_indices = @transform_2, window_bounds = array<i64: 1, 128>}, {transform_indices = @transform_3, window_bounds = array<i64: 128, 128>}, {transform_indices = @transform_4, window_bounds = array<i64: 1, 128>}]} {
    %c0 = arith.constant 0 : index
    %c0_0 = arith.constant 0 : index
    %0 = vector.load %arg1[%c0, %c0_0] : memref<128x128xf32, #tpu.memory_space<vmem>>, vector<128x128xf32>
    %c0_1 = arith.constant 0 : index
    %c0_2 = arith.constant 0 : index
    %1 = vector.load %arg2[%c0_1, %c0_2] : memref<128x128xf32, #tpu.memory_space<vmem>>, vector<128x128xf32>
    %cst = arith.constant dense<0.000000e+00> : vector<128x128xf32>
    %2 = tpu.matmul %0, %1, %cst {dimension_numbers = #tpu.dot_dimension_numbers<[1], [0], [0], [1], [0, 0, 1, 1], [], []>} : vector<128x128xf32>, vector<128x128xf32>, vector<128x128xf32> -> vector<128x128xf32>
    %c0_3 = arith.constant 0 : index
    %c0_4 = arith.constant 0 : index
    %3 = vector.load %arg4[%c0_3, %c0_4] : memref<128x128xf32, #tpu.memory_space<vmem>>, vector<128x128xf32>
    tpu.vector_store %arg4[%c0_3, %c0_4], %2 {strides = array<i32>} : memref<128x128xf32, #tpu.memory_space<vmem>>, vector<128x128xf32>,
    %c0_5 = arith.constant 0 : index
    %c0_6 = arith.constant 0 : index
    %4 = vector.load %arg3[%c0_5, %c0_6] : memref<1x128xf32, #tpu.memory_space<vmem>>, vector<1x128xf32>
    %cst_7 = arith.constant dense<0.000000e+00> : vector<1x128xf32>
    %5 = tpu.matmul %4, %2, %cst_7 {dimension_numbers = #tpu.dot_dimension_numbers<[1], [1], [0], [0], [0, 0, 1, 0], [], []>} : vector<1x128xf32>, vector<128x128xf32>, vector<1x128xf32> -> vector<1x128xf32>
    %c0_8 = arith.constant 0 : index
    %c0_9 = arith.constant 0 : index
    %6 = vector.load %arg5[%c0_8, %c0_9] : memref<1x128xf32, #tpu.memory_space<vmem>>, vector<1x128xf32>
    tpu.vector_store %arg5[%c0_8, %c0_9], %5 {strides = array<i32>} : memref<1x128xf32, #tpu.memory_space<vmem>>, vector<1x128xf32>,
    return
  }
  func.func @transform_0(%arg0: i32) -> (i32, i32) {
    %c0_i32 = arith.constant 0 : i32
    %c0_i32_0 = arith.constant 0 : i32
    return %arg0, %c0_i32 : i32, i32
  }
  func.func @transform_1(%arg0: i32) -> (i32, i32) {
    %c0_i32 = arith.constant 0 : i32
    %c0_i32_0 = arith.constant 0 : i32
    %c0_i32_1 = arith.constant 0 : i32
    return %c0_i32, %c0_i32_0 : i32, i32
  }
  func.func @transform_2(%arg0: i32) -> (i32, i32) {
    %c0_i32 = arith.constant 0 : i32
    %c0_i32_0 = arith.constant 0 : i32
    %c0_i32_1 = arith.constant 0 : i32
    return %c0_i32, %c0_i32_0 : i32, i32
  }
  func.func @transform_3(%arg0: i32) -> (i32, i32) {
    %c0_i32 = arith.constant 0 : i32
    %c0_i32_0 = arith.constant 0 : i32
    return %arg0, %c0_i32 : i32, i32
  }
  func.func @transform_4(%arg0: i32) -> (i32, i32) {
    %c0_i32 = arith.constant 0 : i32
    %c0_i32_0 = arith.constant 0 : i32
    return %c0_i32, %arg0 : i32, i32
  }
}

</mosaic_0001>

<bundles_post_ra>
// kernel: tpu_custom_call.1
= control target key start
LH: loop header
LB: loop body
LE: loop exit
PB: predicated region body
PF: predicated region fallthrough
CT: control target
= control target key end

     0   :  { %10 = vsyncpa [#allocation3], 0  ;;  %s789_s0 = inlined_call_operand.hbm [shape: f32[128,128], index: 0, kind: input, shape index: {}]   ;;  %s790_s1 = inlined_call_operand.hbm [shape: f32[128,128], index: 1, kind: input, shape index: {}]   ;;  %s791_s2 = inlined_call_operand.hbm [shape: f32[1,128], index: 2, kind: input, shape index: {}]   ;;  %s792_s3 = inlined_call_operand.hbm [shape: f32[128,128], index: 3, kind: output, shape index: {0}]   ;;  %s793_s4 = inlined_call_operand.hbm [shape: f32[1,128], index: 4, kind: output, shape index: {1}]  }
   0x1   :  { %11 = vsyncpa [#allocation6], 0 }
   0x2   :  { %12 = vsyncpa [#allocation4], 0 }
   0x3   :  { %13 = vsyncpa [#allocation10], 0  ;;  %s678_s15 = smov [#allocation5]   ;;  %s679_s17 = smov [#allocation2]  }
   0x4   :  { %s31_s16 = sshll.u32 %s678_s15, 4  ;;  %s19_s18 = sshll.u32 %s679_s17, 4  ;;  %s32_s16 = int_to_ptr.vmem [resolvable:$true] %s31_s16  ;;  %s713_s18 = int_to_ptr.vmem [resolvable:$true] %s19_s18 }
   0x5   :  { %s560_s21 = scalar_lea.hbm %s790_s1, 2048 }
   0x6   :  { %p561_p0 = scmp.ne.s32.totalorder %s790_s1, %s560_s21  ;;  %p564_p1 = scmp.lt.u32.totalorder %s560_s21, %s790_s1 }
   0x8   :  { %p566_p2 = pnand %p564_p1, %p561_p0 }
   0xa   :  { %569 = shalt.err (!%p566_p2)
}
   0xb   :  { %s570_s26 = scalar_lea.vmem %s32_s16, 2048  ;;  %p575_p4 = scmp.lt.s32.totalorder %s32_s16, %s32_s16 }
   0xc   :  { %p571_p3 = scmp.ne.s32.totalorder %s32_s16, %s570_s26  ;;  %p576_p5 = scmp.lt.s32.totalorder %s570_s26, %s570_s26 }
   0xe   :  { %p577_p6 = por %p576_p5, %p575_p4 }
  0x10   :  { %p578_p7 = pnand %p577_p6, %p571_p3 }
  0x12   :  { %581 = shalt.err (!%p578_p7)
}
  0x13   :  { %s680_s27 = smov 128   ;;  %s681_s28 = smov 8  }
  0x14   :  { %37 = dma.hbm_to_vmem [thread:$0]  %s790_s1, 2048, %s32_s16, [#allocation6], %s680_s27, %s680_s27, %s681_s28  }
  0x15   :  { %s582_s7 = scalar_lea.hbm %s789_s0, 2048 }
  0x16   :  { %p583_p8 = scmp.ne.s32.totalorder %s789_s0, %s582_s7  ;;  %p586_p9 = scmp.lt.u32.totalorder %s582_s7, %s789_s0 }
  0x18   :  { %p588_p10 = pnand %p586_p9, %p583_p8 }
  0x1a   :  { %591 = shalt.err (!%p588_p10)
}
  0x1b   :  { %s592_s12 = scalar_lea.vmem %s713_s18, 2048  ;;  %p597_p12 = scmp.lt.s32.totalorder %s713_s18, %s713_s18 }
  0x1c   :  { %p593_p11 = scmp.ne.s32.totalorder %s713_s18, %s592_s12  ;;  %p598_p13 = scmp.lt.s32.totalorder %s592_s12, %s592_s12 }
  0x1e   :  { %p599_p0 = por %p598_p13, %p597_p12 }
  0x20   :  { %p600_p1 = pnand %p599_p0, %p593_p11 }
  0x22   :  { %603 = shalt.err (!%p600_p1)
}
  0x23   :  { %25 = dma.hbm_to_vmem [thread:$0]  %s789_s0, 2048, %s713_s18, [#allocation3], %s680_s27, %s680_s27, %s681_s28  }
  0x24   :  { %s682_s14 = smov [#allocation7]   ;;  %s604_s19 = scalar_lea.hbm %s791_s2, 16 }
  0x25   :  { %s44_s15 = sshll.u32 %s682_s14, 4  ;;  %p605_p2 = scmp.ne.s32.totalorder %s791_s2, %s604_s19  ;;  %s45_s15 = int_to_ptr.vmem [resolvable:$true] %s44_s15 }
  0x26   :  { %p608_p3 = scmp.lt.u32.totalorder %s604_s19, %s791_s2 }
  0x28   :  { %p610_p4 = pnand %p608_p3, %p605_p2 }
  0x2a   :  { %613 = shalt.err (!%p610_p4)
}
  0x2b   :  { %s614_s24 = scalar_lea.vmem %s45_s15, 16  ;;  %s618_s0 = scalar_lea.vmem %s45_s15, 32 }
  0x2c   :  { %p615_p5 = scmp.ne.s32.totalorder %s45_s15, %s614_s24  ;;  %p619_p6 = scmp.lt.s32.totalorder %s45_s15, %s45_s15 }
  0x2d   :  { %p620_p7 = scmp.lt.s32.totalorder %s618_s0, %s614_s24 }
  0x2f   :  { %p621_p8 = por %p620_p7, %p619_p6 }
  0x31   :  { %p622_p9 = pnand %p621_p8, %p615_p5 }
  0x33   :  { %625 = shalt.err (!%p622_p9)
}
  0x34   :  { %47 = dma.hbm_to_vmem [thread:$0]  %s791_s2, 16, %s45_s15, [#allocation6]  }
  0x35   :  { %670 = dma.done.wait [#allocation3], 2048  }
  0x36   :  { %671 = vsyncadd [#allocation3], 4294965248 }
  0x37   :  { %672 = dma.done.wait [#allocation6], 2064  }
  0x38   :  { %673 = vsyncadd [#allocation6], 4294965232  ;;  %v73_v0 = vld [vmem:[#allocation5] sm:$0xff]  ;;  %v74_v1 = vld [vmem:[#allocation5 + $0x8] sm:$0xff]  ;;  %v683_v40 = vmov 0.0|0.0   ;;  %vm684_vm0 = vmmov 0  }
  0x39   :  { %v75_v2 = vld [vmem:[#allocation5 + $0x10] sm:$0xff]  ;;  %v494_v3 = vpack.c.bf16 %v74_v1, %v73_v0  ;;  %v76_v4 = vld [vmem:[#allocation5 + $0x18] sm:$0xff]  ;;  %v77_v6 = vld [vmem:[#allocation5 + $0x20] sm:$0xff]  ;;  %526 = vmatprep.subr.bf16.mxu1 %v683_v40  ;;  %v685_v41 = vmov 0.0   ;;  %s686_s2 = smov [#allocation8]  }
  0x3a   :  { %v498_v5 = vpack.c.bf16 %v76_v4, %v75_v2  ;;  %v78_v7 = vld [vmem:[#allocation5 + $0x28] sm:$0xff]  ;;  %v57_v9 = vld [vmem:[#allocation2] sm:$0xff]  ;;  %v79_v10 = vld [vmem:[#allocation5 + $0x30] sm:$0xff]  ;;  %491 = vmatprep.mubr.msk.f32.mxu1 %vm684_vm0, %v685_v41  ;;  %s327_s26 = sshll.u32 %s686_s2, 4  ;;  %s328_s26 = int_to_ptr.vmem [resolvable:$true] %s327_s26 }
  0x3b   :  { %495 = vmatprep.subr.bf16.mxu0 %v494_v3  ;;  %v502_v8 = vpack.c.bf16 %v78_v7, %v77_v6  ;;  %v80_v11 = vld [vmem:[#allocation5 + $0x38] sm:$0xff]  ;;  %435 = vmatprep.mubr.f32.mxu0 %v57_v9  ;;  %v81_v13 = vld [vmem:[#allocation5 + $0x40] sm:$0xff]  ;;  %v82_v14 = vld [vmem:[#allocation5 + $0x48] sm:$0xff]  ;;  %s626_s29 = scalar_lea.vmem %s328_s26, 2048  ;;  %p631_p11 = scmp.lt.s32.totalorder %s328_s26, %s328_s26 }
  0x3c   :  { %497 = vmatpush3.bf16.msra.mxu0 %v494_v3  ;;  %v506_v12 = vpack.c.bf16 %v80_v11, %v79_v10  ;;  %v510_v15 = vpack.c.bf16 %v82_v14, %v81_v13  ;;  %v83_v16 = vld [vmem:[#allocation5 + $0x50] sm:$0xff]  ;;  %v84_v17 = vld [vmem:[#allocation5 + $0x58] sm:$0xff]  ;;  %v85_v19 = vld [vmem:[#allocation5 + $0x60] sm:$0xff]  ;;  %p627_p10 = scmp.ne.s32.totalorder %s328_s26, %s626_s29  ;;  %p632_p12 = scmp.lt.s32.totalorder %s626_s29, %s626_s29 }
  0x3d   :  { %499 = vmatprep.subr.bf16.mxu0 %v498_v5  ;;  %v514_v18 = vpack.c.bf16 %v84_v17, %v83_v16  ;;  %v86_v20 = vld [vmem:[#allocation5 + $0x68] sm:$0xff]  ;;  %v87_v22 = vld [vmem:[#allocation5 + $0x70] sm:$0xff]  ;;  %v88_v23 = vld [vmem:[#allocation5 + $0x78] sm:$0xff] }
  0x3e   :  { %v518_v21 = vpack.c.bf16 %v86_v20, %v85_v19  ;;  %v522_v24 = vpack.c.bf16 %v88_v23, %v87_v22  ;;  %v58_v25 = vld [vmem:[#allocation2 + $0x8] sm:$0xff]  ;;  %v59_v26 = vld [vmem:[#allocation2 + $0x10] sm:$0xff]  ;;  %v60_v27 = vld [vmem:[#allocation2 + $0x18] sm:$0xff]  ;;  %p633_p13 = por %p632_p12, %p631_p11 }
  0x3f   :  { %v61_v28 = vld [vmem:[#allocation2 + $0x20] sm:$0xff]  ;;  %v62_v29 = vld [vmem:[#allocation2 + $0x28] sm:$0xff]  ;;  %v63_v30 = vld [vmem:[#allocation2 + $0x30] sm:$0xff] }
  0x40   :  { %501 = vmatpush3.bf16.msra.mxu0 %v498_v5  ;;  %v64_v31 = vld [vmem:[#allocation2 + $0x38] sm:$0xff]  ;;  %v65_v32 = vld [vmem:[#allocation2 + $0x40] sm:$0xff]  ;;  %v66_v33 = vld [vmem:[#allocation2 + $0x48] sm:$0xff]  ;;  %p634_p0 = pnand %p633_p13, %p627_p10 }
  0x41   :  { %503 = vmatprep.subr.bf16.mxu0 %v502_v8  ;;  %v67_v34 = vld [vmem:[#allocation2 + $0x50] sm:$0xff]  ;;  %v68_v35 = vld [vmem:[#allocation2 + $0x58] sm:$0xff]  ;;  %v69_v36 = vld [vmem:[#allocation2 + $0x60] sm:$0xff] }
  0x42   :  { %v70_v37 = vld [vmem:[#allocation2 + $0x68] sm:$0xff]  ;;  %v71_v38 = vld [vmem:[#allocation2 + $0x70] sm:$0xff]  ;;  %v72_v39 = vld [vmem:[#allocation2 + $0x78] sm:$0xff] }
  0x43   :  { %v250_v2 = vld [vmem:[#allocation7] sm:$0x1] }
  0x44   :  { %505 = vmatpush3.bf16.msra.mxu0 %v502_v8 }
  0x45   :  { %507 = vmatprep.subr.bf16.mxu0 %v506_v12 }
  0x48   :  { %509 = vmatpush3.bf16.msra.mxu0 %v506_v12 }
  0x49   :  { %511 = vmatprep.subr.bf16.mxu0 %v510_v15 }
  0x4c   :  { %513 = vmatpush3.bf16.msra.mxu0 %v510_v15 }
  0x4d   :  { %515 = vmatprep.subr.bf16.mxu0 %v514_v18 }
  0x50   :  { %517 = vmatpush3.bf16.msra.mxu0 %v514_v18 }
  0x51   :  { %519 = vmatprep.subr.bf16.mxu0 %v518_v21 }
  0x54   :  { %521 = vmatpush3.bf16.msra.mxu0 %v518_v21 }
  0x55   :  { %523 = vmatprep.subr.bf16.mxu0 %v522_v24 }
  0x58   :  { %525 = vmatpush3.bf16.msra.mxu0 %v522_v24 }
  0x5b   :  { %436 = vmatmul.mubr.f32.vlgmr.msra.gmra.mrb[0].mxu0 %v58_v25 }
  0x5c   :  { %438 = vmatprep.mubr.f32.mxu0 %v59_v26 }
  0x5f   :  { %439 = vmatmul.mubr.f32.gmra.mrb[2].mxu0 %v60_v27 }
  0x60   :  { %441 = vmatprep.mubr.f32.mxu0 %v61_v28 }
  0x63   :  { %442 = vmatmul.mubr.f32.gmra.mrb[4].mxu0 %v62_v29 }
  0x64   :  { %444 = vmatprep.mubr.f32.mxu0 %v63_v30 }
  0x67   :  { %445 = vmatmul.mubr.f32.gmra.mrb[6].mxu0 %v64_v31 }
  0x68   :  { %447 = vmatprep.mubr.f32.mxu0 %v65_v32 }
  0x6b   :  { %448 = vmatmul.mubr.f32.gmra.mrb[8].mxu0 %v66_v33 }
  0x6c   :  { %450 = vmatprep.mubr.f32.mxu0 %v67_v34 }
  0x6f   :  { %451 = vmatmul.mubr.f32.gmra.mrb[10].mxu0 %v68_v35 }
  0x70   :  { %453 = vmatprep.mubr.f32.mxu0 %v69_v36 }
  0x73   :  { %454 = vmatmul.mubr.f32.gmra.mrb[12].mxu0 %v70_v37 }
  0x74   :  { %456 = vmatprep.mubr.f32.mxu0 %v71_v38 }
  0x77   :  { %457 = vmatmul.mubr.f32.gmra.mrb[14].mxu0 %v72_v39 }
 0x12e   :  { %v437_v42 = vpop.f32.mrb[0].mxu0 }
 0x12f   :  { %235 = vst [vmem:[#allocation8 + $0x8] sm:$0xff] %v437_v42  ;;  %v155_v43 = vpop.f32.mrb[1].mxu0 }
 0x130   :  { %234 = vst [vmem:[#allocation8] sm:$0xff] %v155_v43  ;;  %v527_v44 = vpack.c.bf16 %v437_v42, %v155_v43 }
 0x132   :  { %528 = vmatpush3.bf16.xpose.msra.mxu1 %v527_v44  ;;  %v440_v45 = vpop.f32.mrb[2].mxu0 }
 0x133   :  { %237 = vst [vmem:[#allocation8 + $0x18] sm:$0xff] %v440_v45  ;;  %v165_v46 = vpop.f32.mrb[3].mxu0  ;;  %529 = vmatprep.subr.bf16.mxu1 %v683_v40 }
 0x134   :  { %236 = vst [vmem:[#allocation8 + $0x10] sm:$0xff] %v165_v46  ;;  %v530_v47 = vpack.c.bf16 %v440_v45, %v165_v46 }
 0x136   :  { %v443_v48 = vpop.f32.mrb[4].mxu0 }
 0x137   :  { %239 = vst [vmem:[#allocation8 + $0x28] sm:$0xff] %v443_v48  ;;  %v175_v49 = vpop.f32.mrb[5].mxu0 }
 0x138   :  { %238 = vst [vmem:[#allocation8 + $0x20] sm:$0xff] %v175_v49  ;;  %v533_v50 = vpack.c.bf16 %v443_v48, %v175_v49 }
 0x13a   :  { %531 = vmatpush3.bf16.xpose.msra.mxu1 %v530_v47  ;;  %v446_v51 = vpop.f32.mrb[6].mxu0 }
 0x13b   :  { %532 = vmatprep.subr.bf16.mxu1 %v683_v40  ;;  %241 = vst [vmem:[#allocation8 + $0x38] sm:$0xff] %v446_v51  ;;  %v185_v52 = vpop.f32.mrb[7].mxu0 }
 0x13c   :  { %240 = vst [vmem:[#allocation8 + $0x30] sm:$0xff] %v185_v52  ;;  %v536_v53 = vpack.c.bf16 %v446_v51, %v185_v52 }
 0x13e   :  { %v449_v54 = vpop.f32.mrb[8].mxu0 }
 0x13f   :  { %243 = vst [vmem:[#allocation8 + $0x48] sm:$0xff] %v449_v54  ;;  %v195_v55 = vpop.f32.mrb[9].mxu0 }
 0x140   :  { %242 = vst [vmem:[#allocation8 + $0x40] sm:$0xff] %v195_v55  ;;  %v539_v56 = vpack.c.bf16 %v449_v54, %v195_v55 }
 0x142   :  { %534 = vmatpush3.bf16.xpose.msra.mxu1 %v533_v50  ;;  %v452_v57 = vpop.f32.mrb[10].mxu0 }
 0x143   :  { %535 = vmatprep.subr.bf16.mxu1 %v683_v40  ;;  %245 = vst [vmem:[#allocation8 + $0x58] sm:$0xff] %v452_v57  ;;  %v205_v58 = vpop.f32.mrb[11].mxu0 }
 0x144   :  { %244 = vst [vmem:[#allocation8 + $0x50] sm:$0xff] %v205_v58  ;;  %v542_v59 = vpack.c.bf16 %v452_v57, %v205_v58 }
 0x146   :  { %v455_v60 = vpop.f32.mrb[12].mxu0 }
 0x147   :  { %247 = vst [vmem:[#allocation8 + $0x68] sm:$0xff] %v455_v60  ;;  %v215_v61 = vpop.f32.mrb[13].mxu0 }
 0x148   :  { %246 = vst [vmem:[#allocation8 + $0x60] sm:$0xff] %v215_v61  ;;  %v545_v62 = vpack.c.bf16 %v455_v60, %v215_v61 }
 0x14a   :  { %537 = vmatpush3.bf16.xpose.msra.mxu1 %v536_v53  ;;  %v458_v63 = vpop.f32.mrb[14].mxu0 }
 0x14b   :  { %538 = vmatprep.subr.bf16.mxu1 %v683_v40  ;;  %249 = vst [vmem:[#allocation8 + $0x78] sm:$0xff] %v458_v63  ;;  %v225_v0 = vpop.f32.mrb[15].mxu0 }
 0x14c   :  { %248 = vst [vmem:[#allocation8 + $0x70] sm:$0xff] %v225_v0  ;;  %v548_v1 = vpack.c.bf16 %v458_v63, %v225_v0 }
 0x152   :  { %540 = vmatpush3.bf16.xpose.msra.mxu1 %v539_v56 }
 0x153   :  { %541 = vmatprep.subr.bf16.mxu1 %v683_v40 }
 0x15a   :  { %543 = vmatpush3.bf16.xpose.msra.mxu1 %v542_v59 }
 0x15b   :  { %544 = vmatprep.subr.bf16.mxu1 %v683_v40 }
 0x162   :  { %546 = vmatpush3.bf16.xpose.msra.mxu1 %v545_v62 }
 0x163   :  { %547 = vmatprep.subr.bf16.mxu1 %v683_v40 }
 0x16a   :  { %549 = vmatpush3.bf16.xpose.msra.mxu1 %v548_v1 }
 0x171   :  { %492 = vmatmul.mubr.f32.vlgmr.msra.gmra.mrb[0].mxu1 %v250_v2 }
 0x172   :  { %637 = shalt.err (!%p634_p0)
}
 0x173   :  { %s638_s6 = scalar_lea.hbm %s792_s3, 2048 }
 0x174   :  { %p639_p1 = scmp.ne.s32.totalorder %s792_s3, %s638_s6  ;;  %p642_p2 = scmp.lt.u32.totalorder %s638_s6, %s792_s3 }
 0x176   :  { %p644_p3 = pnand %p642_p2, %p639_p1 }
 0x178   :  { %647 = shalt.err (!%p644_p3)
}
 0x179   :  { %333 = dma.vmem_to_hbm [thread:$0]  %s328_s26, 2048, %s792_s3, [#allocation4], %s680_s27, %s680_s27, %s681_s28  }
 0x17a   :  { %s687_s1 = smov [#allocation9]  }
 0x17b   :  { %s340_s13 = sshll.u32 %s687_s1, 4  ;;  %s341_s13 = int_to_ptr.vmem [resolvable:$true] %s340_s13 }
 0x17c   :  { %s648_s14 = scalar_lea.vmem %s341_s13, 16  ;;  %s652_s15 = scalar_lea.vmem %s341_s13, 32 }
 0x17d   :  { %p649_p4 = scmp.ne.s32.totalorder %s341_s13, %s648_s14  ;;  %p653_p5 = scmp.lt.s32.totalorder %s341_s13, %s341_s13 }
 0x17e   :  { %p654_p6 = scmp.lt.s32.totalorder %s652_s15, %s648_s14 }
 0x180   :  { %p655_p7 = por %p654_p6, %p653_p5 }
 0x182   :  { %p656_p8 = pnand %p655_p7, %p649_p4 }
 0x244   :  { %v317_v3 = vpop.f32.mrb[0].mxu1 }
 0x245   :  { %321 = vst [vmem:[#allocation9] sm:$0x1] %v317_v3  ;;  %v493_v4 = vpop.f32.mrb[1].mxu1 }
 0x246   :  { %659 = shalt.err (!%p656_p8)
}
 0x247   :  { %s660_s19 = scalar_lea.hbm %s793_s4, 16 }
 0x248   :  { %p661_p9 = scmp.ne.s32.totalorder %s793_s4, %s660_s19  ;;  %p664_p10 = scmp.lt.u32.totalorder %s660_s19, %s793_s4 }
 0x24a   :  { %p666_p11 = pnand %p664_p10, %p661_p9 }
 0x24c   :  { %669 = shalt.err (!%p666_p11)
}
 0x24d   :  { %343 = dma.vmem_to_hbm [thread:$0]  %s341_s13, 16, %s793_s4, [#allocation10]  }
 0x24e   :  { %674 = dma.done.wait [#allocation4], 2048  }
 0x24f   :  { %675 = vsyncadd [#allocation4], 4294965248 }
 0x250   :  { %676 = dma.done.wait [#allocation10], 16  }
 0x251   :  { %677 = vsyncadd [#allocation10], 4294967280 }
 0x252   :  { %350 = vsyncpa [#allocation3], 1 }
 0x253   :  { %351 = vsyncpa [#allocation6], 1 }
 0x254   :  { %352 = vsyncpa [#allocation4], 1 }
 0x255   :  { %353 = vsyncpa [#allocation10], 1 }

// kernel: tpu_custom_call.1
= control target key start
LH: loop header
LB: loop body
LE: loop exit
PB: predicated region body
PF: predicated region fallthrough
CT: control target
= control target key end

     0   :  { %10 = vsyncpa [#allocation3], 0  ;;  %s789_s0 = inlined_call_operand.hbm [shape: f32[128,128], index: 0, kind: input, shape index: {}]   ;;  %s790_s1 = inlined_call_operand.hbm [shape: f32[128,128], index: 1, kind: input, shape index: {}]   ;;  %s791_s2 = inlined_call_operand.hbm [shape: f32[1,128], index: 2, kind: input, shape index: {}]   ;;  %s792_s3 = inlined_call_operand.hbm [shape: f32[128,128], index: 3, kind: output, shape index: {0}]   ;;  %s793_s4 = inlined_call_operand.hbm [shape: f32[1,128], index: 4, kind: output, shape index: {1}]  }
   0x1   :  { %11 = vsyncpa [#allocation6], 0 }
   0x2   :  { %12 = vsyncpa [#allocation4], 0 }
   0x3   :  { %13 = vsyncpa [#allocation10], 0  ;;  %s678_s15 = smov [#allocation5]   ;;  %s679_s17 = smov [#allocation2]  }
   0x4   :  { %s31_s16 = sshll.u32 %s678_s15, 4  ;;  %s19_s18 = sshll.u32 %s679_s17, 4  ;;  %s32_s16 = int_to_ptr.vmem [resolvable:$true] %s31_s16  ;;  %s713_s18 = int_to_ptr.vmem [resolvable:$true] %s19_s18 }
   0x5   :  { %s560_s21 = scalar_lea.hbm %s790_s1, 2048 }
   0x6   :  { %p561_p0 = scmp.ne.s32.totalorder %s790_s1, %s560_s21  ;;  %p564_p1 = scmp.lt.u32.totalorder %s560_s21, %s790_s1 }
   0x8   :  { %p566_p2 = pnand %p564_p1, %p561_p0 }
   0xa   :  { %569 = shalt.err (!%p566_p2)
}
   0xb   :  { %s570_s26 = scalar_lea.vmem %s32_s16, 2048  ;;  %p575_p4 = scmp.lt.s32.totalorder %s32_s16, %s32_s16 }
   0xc   :  { %p571_p3 = scmp.ne.s32.totalorder %s32_s16, %s570_s26  ;;  %p576_p5 = scmp.lt.s32.totalorder %s570_s26, %s570_s26 }
   0xe   :  { %p577_p6 = por %p576_p5, %p575_p4 }
  0x10   :  { %p578_p7 = pnand %p577_p6, %p571_p3 }
  0x12   :  { %581 = shalt.err (!%p578_p7)
}
  0x13   :  { %s680_s27 = smov 128   ;;  %s681_s28 = smov 8  }
  0x14   :  { %37 = dma.hbm_to_vmem [thread:$0]  %s790_s1, 2048, %s32_s16, [#allocation6], %s680_s27, %s680_s27, %s681_s28  }
  0x15   :  { %s582_s7 = scalar_lea.hbm %s789_s0, 2048 }
  0x16   :  { %p583_p8 = scmp.ne.s32.totalorder %s789_s0, %s582_s7  ;;  %p586_p9 = scmp.lt.u32.totalorder %s582_s7, %s789_s0 }
  0x18   :  { %p588_p10 = pnand %p586_p9, %p583_p8 }
  0x1a   :  { %591 = shalt.err (!%p588_p10)
}
  0x1b   :  { %s592_s12 = scalar_lea.vmem %s713_s18, 2048  ;;  %p597_p12 = scmp.lt.s32.totalorder %s713_s18, %s713_s18 }
  0x1c   :  { %p593_p11 = scmp.ne.s32.totalorder %s713_s18, %s592_s12  ;;  %p598_p13 = scmp.lt.s32.totalorder %s592_s12, %s592_s12 }
  0x1e   :  { %p599_p0 = por %p598_p13, %p597_p12 }
  0x20   :  { %p600_p1 = pnand %p599_p0, %p593_p11 }
  0x22   :  { %603 = shalt.err (!%p600_p1)
}
  0x23   :  { %25 = dma.hbm_to_vmem [thread:$0]  %s789_s0, 2048, %s713_s18, [#allocation3], %s680_s27, %s680_s27, %s681_s28  }
  0x24   :  { %s682_s14 = smov [#allocation7]   ;;  %s604_s19 = scalar_lea.hbm %s791_s2, 16 }
  0x25   :  { %s44_s15 = sshll.u32 %s682_s14, 4  ;;  %p605_p2 = scmp.ne.s32.totalorder %s791_s2, %s604_s19  ;;  %s45_s15 = int_to_ptr.vmem [resolvable:$true] %s44_s15 }
  0x26   :  { %p608_p3 = scmp.lt.u32.totalorder %s604_s19, %s791_s2 }
  0x28   :  { %p610_p4 = pnand %p608_p3, %p605_p2 }
  0x2a   :  { %613 = shalt.err (!%p610_p4)
}
  0x2b   :  { %s614_s24 = scalar_lea.vmem %s45_s15, 16  ;;  %s618_s0 = scalar_lea.vmem %s45_s15, 32 }
  0x2c   :  { %p615_p5 = scmp.ne.s32.totalorder %s45_s15, %s614_s24  ;;  %p619_p6 = scmp.lt.s32.totalorder %s45_s15, %s45_s15 }
  0x2d   :  { %p620_p7 = scmp.lt.s32.totalorder %s618_s0, %s614_s24 }
  0x2f   :  { %p621_p8 = por %p620_p7, %p619_p6 }
  0x31   :  { %p622_p9 = pnand %p621_p8, %p615_p5 }
  0x33   :  { %625 = shalt.err (!%p622_p9)
}
  0x34   :  { %47 = dma.hbm_to_vmem [thread:$0]  %s791_s2, 16, %s45_s15, [#allocation6]  }
  0x35   :  { %670 = dma.done.wait [#allocation3], 2048  }
  0x36   :  { %671 = vsyncadd [#allocation3], 4294965248 }
  0x37   :  { %672 = dma.done.wait [#allocation6], 2064  }
  0x38   :  { %673 = vsyncadd [#allocation6], 4294965232  ;;  %v73_v0 = vld [vmem:[#allocation5] sm:$0xff]  ;;  %v74_v1 = vld [vmem:[#allocation5 + $0x8] sm:$0xff]  ;;  %v683_v40 = vmov 0.0|0.0   ;;  %vm684_vm0 = vmmov 0  }
  0x39   :  { %v75_v2 = vld [vmem:[#allocation5 + $0x10] sm:$0xff]  ;;  %v494_v3 = vpack.c.bf16 %v74_v1, %v73_v0  ;;  %v76_v4 = vld [vmem:[#allocation5 + $0x18] sm:$0xff]  ;;  %v77_v6 = vld [vmem:[#allocation5 + $0x20] sm:$0xff]  ;;  %526 = vmatprep.subr.bf16.mxu1 %v683_v40  ;;  %v685_v41 = vmov 0.0   ;;  %s686_s2 = smov [#allocation8]  }
  0x3a   :  { %v498_v5 = vpack.c.bf16 %v76_v4, %v75_v2  ;;  %v78_v7 = vld [vmem:[#allocation5 + $0x28] sm:$0xff]  ;;  %v57_v9 = vld [vmem:[#allocation2] sm:$0xff]  ;;  %v79_v10 = vld [vmem:[#allocation5 + $0x30] sm:$0xff]  ;;  %491 = vmatprep.mubr.msk.f32.mxu1 %vm684_vm0, %v685_v41  ;;  %s327_s26 = sshll.u32 %s686_s2, 4  ;;  %s328_s26 = int_to_ptr.vmem [resolvable:$true] %s327_s26 }
  0x3b   :  { %495 = vmatprep.subr.bf16.mxu0 %v494_v3  ;;  %v502_v8 = vpack.c.bf16 %v78_v7, %v77_v6  ;;  %v80_v11 = vld [vmem:[#allocation5 + $0x38] sm:$0xff]  ;;  %435 = vmatprep.mubr.f32.mxu0 %v57_v9  ;;  %v81_v13 = vld [vmem:[#allocation5 + $0x40] sm:$0xff]  ;;  %v82_v14 = vld [vmem:[#allocation5 + $0x48] sm:$0xff]  ;;  %s626_s29 = scalar_lea.vmem %s328_s26, 2048  ;;  %p631_p11 = scmp.lt.s32.totalorder %s328_s26, %s328_s26 }
  0x3c   :  { %497 = vmatpush3.bf16.msra.mxu0 %v494_v3  ;;  %v506_v12 = vpack.c.bf16 %v80_v11, %v79_v10  ;;  %v510_v15 = vpack.c.bf16 %v82_v14, %v81_v13  ;;  %v83_v16 = vld [vmem:[#allocation5 + $0x50] sm:$0xff]  ;;  %v84_v17 = vld [vmem:[#allocation5 + $0x58] sm:$0xff]  ;;  %v85_v19 = vld [vmem:[#allocation5 + $0x60] sm:$0xff]  ;;  %p627_p10 = scmp.ne.s32.totalorder %s328_s26, %s626_s29  ;;  %p632_p12 = scmp.lt.s32.totalorder %s626_s29, %s626_s29 }
  0x3d   :  { %499 = vmatprep.subr.bf16.mxu0 %v498_v5  ;;  %v514_v18 = vpack.c.bf16 %v84_v17, %v83_v16  ;;  %v86_v20 = vld [vmem:[#allocation5 + $0x68] sm:$0xff]  ;;  %v87_v22 = vld [vmem:[#allocation5 + $0x70] sm:$0xff]  ;;  %v88_v23 = vld [vmem:[#allocation5 + $0x78] sm:$0xff] }
  0x3e   :  { %v518_v21 = vpack.c.bf16 %v86_v20, %v85_v19  ;;  %v522_v24 = vpack.c.bf16 %v88_v23, %v87_v22  ;;  %v58_v25 = vld [vmem:[#allocation2 + $0x8] sm:$0xff]  ;;  %v59_v26 = vld [vmem:[#allocation2 + $0x10] sm:$0xff]  ;;  %v60_v27 = vld [vmem:[#allocation2 + $0x18] sm:$0xff]  ;;  %p633_p13 = por %p632_p12, %p631_p11 }
  0x3f   :  { %v61_v28 = vld [vmem:[#allocation2 + $0x20] sm:$0xff]  ;;  %v62_v29 = vld [vmem:[#allocation2 + $0x28] sm:$0xff]  ;;  %v63_v30 = vld [vmem:[#allocation2 + $0x30] sm:$0xff] }
  0x40   :  { %501 = vmatpush3.bf16.msra.mxu0 %v498_v5  ;;  %v64_v31 = vld [vmem:[#allocation2 + $0x38] sm:$0xff]  ;;  %v65_v32 = vld [vmem:[#allocation2 + $0x40] sm:$0xff]  ;;  %v66_v33 = vld [vmem:[#allocation2 + $0x48] sm:$0xff]  ;;  %p634_p0 = pnand %p633_p13, %p627_p10 }
  0x41   :  { %503 = vmatprep.subr.bf16.mxu0 %v502_v8  ;;  %v67_v34 = vld [vmem:[#allocation2 + $0x50] sm:$0xff]  ;;  %v68_v35 = vld [vmem:[#allocation2 + $0x58] sm:$0xff]  ;;  %v69_v36 = vld [vmem:[#allocation2 + $0x60] sm:$0xff] }
  0x42   :  { %v70_v37 = vld [vmem:[#allocation2 + $0x68] sm:$0xff]  ;;  %v71_v38 = vld [vmem:[#allocation2 + $0x70] sm:$0xff]  ;;  %v72_v39 = vld [vmem:[#allocation2 + $0x78] sm:$0xff] }
  0x43   :  { %v250_v2 = vld [vmem:[#allocation7] sm:$0x1] }
  0x44   :  { %505 = vmatpush3.bf16.msra.mxu0 %v502_v8 }
  0x45   :  { %507 = vmatprep.subr.bf16.mxu0 %v506_v12 }
  0x48   :  { %509 = vmatpush3.bf16.msra.mxu0 %v506_v12 }
  0x49   :  { %511 = vmatprep.subr.bf16.mxu0 %v510_v15 }
  0x4c   :  { %513 = vmatpush3.bf16.msra.mxu0 %v510_v15 }
  0x4d   :  { %515 = vmatprep.subr.bf16.mxu0 %v514_v18 }
  0x50   :  { %517 = vmatpush3.bf16.msra.mxu0 %v514_v18 }
  0x51   :  { %519 = vmatprep.subr.bf16.mxu0 %v518_v21 }
  0x54   :  { %521 = vmatpush3.bf16.msra.mxu0 %v518_v21 }
  0x55   :  { %523 = vmatprep.subr.bf16.mxu0 %v522_v24 }
  0x58   :  { %525 = vmatpush3.bf16.msra.mxu0 %v522_v24 }
  0x5b   :  { %436 = vmatmul.mubr.f32.vlgmr.msra.gmra.mrb[0].mxu0 %v58_v25 }
  0x5c   :  { %438 = vmatprep.mubr.f32.mxu0 %v59_v26 }
  0x5f   :  { %439 = vmatmul.mubr.f32.gmra.mrb[2].mxu0 %v60_v27 }
  0x60   :  { %441 = vmatprep.mubr.f32.mxu0 %v61_v28 }
  0x63   :  { %442 = vmatmul.mubr.f32.gmra.mrb[4].mxu0 %v62_v29 }
  0x64   :  { %444 = vmatprep.mubr.f32.mxu0 %v63_v30 }
  0x67   :  { %445 = vmatmul.mubr.f32.gmra.mrb[6].mxu0 %v64_v31 }
  0x68   :  { %447 = vmatprep.mubr.f32.mxu0 %v65_v32 }
  0x6b   :  { %448 = vmatmul.mubr.f32.gmra.mrb[8].mxu0 %v66_v33 }
  0x6c   :  { %450 = vmatprep.mubr.f32.mxu0 %v67_v34 }
  0x6f   :  { %451 = vmatmul.mubr.f32.gmra.mrb[10].mxu0 %v68_v35 }
  0x70   :  { %453 = vmatprep.mubr.f32.mxu0 %v69_v36 }
  0x73   :  { %454 = vmatmul.mubr.f32.gmra.mrb[12].mxu0 %v70_v37 }
  0x74   :  { %456 = vmatprep.mubr.f32.mxu0 %v71_v38 }
  0x77   :  { %457 = vmatmul.mubr.f32.gmra.mrb[14].mxu0 %v72_v39 }
 0x12e   :  { %v437_v42 = vpop.f32.mrb[0].mxu0 }
 0x12f   :  { %235 = vst [vmem:[#allocation8 + $0x8] sm:$0xff] %v437_v42  ;;  %v155_v43 = vpop.f32.mrb[1].mxu0 }
 0x130   :  { %234 = vst [vmem:[#allocation8] sm:$0xff] %v155_v43  ;;  %v527_v44 = vpack.c.bf16 %v437_v42, %v155_v43 }
 0x132   :  { %528 = vmatpush3.bf16.xpose.msra.mxu1 %v527_v44  ;;  %v440_v45 = vpop.f32.mrb[2].mxu0 }
 0x133   :  { %237 = vst [vmem:[#allocation8 + $0x18] sm:$0xff] %v440_v45  ;;  %v165_v46 = vpop.f32.mrb[3].mxu0  ;;  %529 = vmatprep.subr.bf16.mxu1 %v683_v40 }
 0x134   :  { %236 = vst [vmem:[#allocation8 + $0x10] sm:$0xff] %v165_v46  ;;  %v530_v47 = vpack.c.bf16 %v440_v45, %v165_v46 }
 0x136   :  { %v443_v48 = vpop.f32.mrb[4].mxu0 }
 0x137   :  { %239 = vst [vmem:[#allocation8 + $0x28] sm:$0xff] %v443_v48  ;;  %v175_v49 = vpop.f32.mrb[5].mxu0 }
 0x138   :  { %238 = vst [vmem:[#allocation8 + $0x20] sm:$0xff] %v175_v49  ;;  %v533_v50 = vpack.c.bf16 %v443_v48, %v175_v49 }
 0x13a   :  { %531 = vmatpush3.bf16.xpose.msra.mxu1 %v530_v47  ;;  %v446_v51 = vpop.f32.mrb[6].mxu0 }
 0x13b   :  { %532 = vmatprep.subr.bf16.mxu1 %v683_v40  ;;  %241 = vst [vmem:[#allocation8 + $0x38] sm:$0xff] %v446_v51  ;;  %v185_v52 = vpop.f32.mrb[7].mxu0 }
 0x13c   :  { %240 = vst [vmem:[#allocation8 + $0x30] sm:$0xff] %v185_v52  ;;  %v536_v53 = vpack.c.bf16 %v446_v51, %v185_v52 }
 0x13e   :  { %v449_v54 = vpop.f32.mrb[8].mxu0 }
 0x13f   :  { %243 = vst [vmem:[#allocation8 + $0x48] sm:$0xff] %v449_v54  ;;  %v195_v55 = vpop.f32.mrb[9].mxu0 }
 0x140   :  { %242 = vst [vmem:[#allocation8 + $0x40] sm:$0xff] %v195_v55  ;;  %v539_v56 = vpack.c.bf16 %v449_v54, %v195_v55 }
 0x142   :  { %534 = vmatpush3.bf16.xpose.msra.mxu1 %v533_v50  ;;  %v452_v57 = vpop.f32.mrb[10].mxu0 }
 0x143   :  { %535 = vmatprep.subr.bf16.mxu1 %v683_v40  ;;  %245 = vst [vmem:[#allocation8 + $0x58] sm:$0xff] %v452_v57  ;;  %v205_v58 = vpop.f32.mrb[11].mxu0 }
 0x144   :  { %244 = vst [vmem:[#allocation8 + $0x50] sm:$0xff] %v205_v58  ;;  %v542_v59 = vpack.c.bf16 %v452_v57, %v205_v58 }
 0x146   :  { %v455_v60 = vpop.f32.mrb[12].mxu0 }
 0x147   :  { %247 = vst [vmem:[#allocation8 + $0x68] sm:$0xff] %v455_v60  ;;  %v215_v61 = vpop.f32.mrb[13].mxu0 }
 0x148   :  { %246 = vst [vmem:[#allocation8 + $0x60] sm:$0xff] %v215_v61  ;;  %v545_v62 = vpack.c.bf16 %v455_v60, %v215_v61 }
 0x14a   :  { %537 = vmatpush3.bf16.xpose.msra.mxu1 %v536_v53  ;;  %v458_v63 = vpop.f32.mrb[14].mxu0 }
 0x14b   :  { %538 = vmatprep.subr.bf16.mxu1 %v683_v40  ;;  %249 = vst [vmem:[#allocation8 + $0x78] sm:$0xff] %v458_v63  ;;  %v225_v0 = vpop.f32.mrb[15].mxu0 }
 0x14c   :  { %248 = vst [vmem:[#allocation8 + $0x70] sm:$0xff] %v225_v0  ;;  %v548_v1 = vpack.c.bf16 %v458_v63, %v225_v0 }
 0x152   :  { %540 = vmatpush3.bf16.xpose.msra.mxu1 %v539_v56 }
 0x153   :  { %541 = vmatprep.subr.bf16.mxu1 %v683_v40 }
 0x15a   :  { %543 = vmatpush3.bf16.xpose.msra.mxu1 %v542_v59 }
 0x15b   :  { %544 = vmatprep.subr.bf16.mxu1 %v683_v40 }
 0x162   :  { %546 = vmatpush3.bf16.xpose.msra.mxu1 %v545_v62 }
 0x163   :  { %547 = vmatprep.subr.bf16.mxu1 %v683_v40 }
 0x16a   :  { %549 = vmatpush3.bf16.xpose.msra.mxu1 %v548_v1 }
 0x171   :  { %492 = vmatmul.mubr.f32.vlgmr.msra.gmra.mrb[0].mxu1 %v250_v2 }
 0x172   :  { %637 = shalt.err (!%p634_p0)
}
 0x173   :  { %s638_s6 = scalar_lea.hbm %s792_s3, 2048 }
 0x174   :  { %p639_p1 = scmp.ne.s32.totalorder %s792_s3, %s638_s6  ;;  %p642_p2 = scmp.lt.u32.totalorder %s638_s6, %s792_s3 }
 0x176   :  { %p644_p3 = pnand %p642_p2, %p639_p1 }
 0x178   :  { %647 = shalt.err (!%p644_p3)
}
 0x179   :  { %333 = dma.vmem_to_hbm [thread:$0]  %s328_s26, 2048, %s792_s3, [#allocation4], %s680_s27, %s680_s27, %s681_s28  }
 0x17a   :  { %s687_s1 = smov [#allocation9]  }
 0x17b   :  { %s340_s13 = sshll.u32 %s687_s1, 4  ;;  %s341_s13 = int_to_ptr.vmem [resolvable:$true] %s340_s13 }
 0x17c   :  { %s648_s14 = scalar_lea.vmem %s341_s13, 16  ;;  %s652_s15 = scalar_lea.vmem %s341_s13, 32 }
 0x17d   :  { %p649_p4 = scmp.ne.s32.totalorder %s341_s13, %s648_s14  ;;  %p653_p5 = scmp.lt.s32.totalorder %s341_s13, %s341_s13 }
 0x17e   :  { %p654_p6 = scmp.lt.s32.totalorder %s652_s15, %s648_s14 }
 0x180   :  { %p655_p7 = por %p654_p6, %p653_p5 }
 0x182   :  { %p656_p8 = pnand %p655_p7, %p649_p4 }
 0x244   :  { %v317_v3 = vpop.f32.mrb[0].mxu1 }
 0x245   :  { %321 = vst [vmem:[#allocation9] sm:$0x1] %v317_v3  ;;  %v493_v4 = vpop.f32.mrb[1].mxu1 }
 0x246   :  { %659 = shalt.err (!%p656_p8)
}
 0x247   :  { %s660_s19 = scalar_lea.hbm %s793_s4, 16 }
 0x248   :  { %p661_p9 = scmp.ne.s32.totalorder %s793_s4, %s660_s19  ;;  %p664_p10 = scmp.lt.u32.totalorder %s660_s19, %s793_s4 }
 0x24a   :  { %p666_p11 = pnand %p664_p10, %p661_p9 }
 0x24c   :  { %669 = shalt.err (!%p666_p11)
}
 0x24d   :  { %343 = dma.vmem_to_hbm [thread:$0]  %s341_s13, 16, %s793_s4, [#allocation10]  }
 0x24e   :  { %674 = dma.done.wait [#allocation4], 2048  }
 0x24f   :  { %675 = vsyncadd [#allocation4], 4294965248 }
 0x250   :  { %676 = dma.done.wait [#allocation10], 16  }
 0x251   :  { %677 = vsyncadd [#allocation10], 4294967280 }
 0x252   :  { %350 = vsyncpa [#allocation3], 1 }
 0x253   :  { %351 = vsyncpa [#allocation6], 1 }
 0x254   :  { %352 = vsyncpa [#allocation4], 1 }
 0x255   :  { %353 = vsyncpa [#allocation10], 1 }

</bundles_post_ra>
